<compile_context>
chip_gen: v5e
topology: v5e:2x2
jax: 0.10.0
libtpu: 0.0.40
codegen_flags: <defaults>
</compile_context>

<pallas_src>
import functools

import jax
import jax.numpy as jnp
from jax.experimental import pallas as pl
from jax.experimental.pallas import tpu as pltpu


def _se_kernel(x_ref, w1_ref, w2_ref, o_ref, *, n_pool_chunks):
    # x_ref : (bb, C, HW)  input dtype (f32 or bf16), spatial on the lane axis
    # w1_ref: (C, hidden)  f32  (= W1.T, so the squeeze is y @ w1)
    # w2_ref: (hidden, C)  f32  (= W2.T)
    # o_ref : (bb, C, HW)  input dtype
    bb, C, HW = x_ref.shape
    chunk = HW // n_pool_chunks

    # Squeeze: global average pool over the spatial (lane) axis, accumulated in f32.
    # Chunked over static lane sub-slices so we never materialize a full-tile f32 copy.
    acc = jnp.zeros((bb, C), jnp.float32)
    for ci in range(n_pool_chunks):               # n_pool_chunks is small & static (<= 8)
        xc = x_ref[:, :, ci * chunk:(ci + 1) * chunk]
        acc = acc + jnp.sum(xc.astype(jnp.float32), axis=-1)
    y = acc * (1.0 / HW)                                               # (bb, C)

    # Excitation: Linear -> ReLU -> Linear -> Sigmoid, all f32 (FLOPs negligible).
    h = jnp.dot(y, w1_ref[...], preferred_element_type=jnp.float32)    # (bb, hidden)
    h = jnp.maximum(h, 0.0)
    s = jnp.dot(h, w2_ref[...], preferred_element_type=jnp.float32)    # (bb, C)
    s = jax.nn.sigmoid(s)

    # Scale: per-(batch, channel) gate broadcast along the lane (spatial) axis.
    gate = s.astype(o_ref.dtype)[:, :, None]                           # (bb, C, 1)
    o_ref[...] = x_ref[...] * gate


def _vmem_budget():
    """(tile budget for double-buffered x/out blocks, scoped-VMEM limit), per generation."""
    try:
        cap = int(pltpu.get_tpu_info().vmem_capacity_bytes)
    except Exception:
        cap = 64 << 20                      # conservative (v7x-sized) fallback
    if cap >= (128 << 20):                  # v5e / v6e: 128 MiB physical VMEM
        return 72 << 20, 100 << 20
    return 36 << 20, 52 << 20               # v7x: 64 MiB per TensorCore, leave headroom


def _pick_batch_block(B, C, HW, itemsize, tile_budget):
    """Largest bb dividing B such that double-buffered in+out tiles fit the budget,
    while keeping >= min(B, 4) grid steps (megacore sharding + DMA/compute overlap)."""
    per_row = 4 * C * HW * itemsize + 8 * C        # 2x input + 2x output buffers (+ f32 acc)
    bb = max(1, int(tile_budget // max(per_row, 1)))
    bb = min(bb, B, max(1, B // min(B, 4)))
    while B % bb:
        bb -= 1
    return bb


def _pick_pool_chunks(HW, C, bb):
    """Static lane-chunk count for the f32 pooling accumulation (~<=1 MiB f32 per chunk)."""
    n = 1
    while n < 8 and HW % (2 * n) == 0 and bb * C * (HW // n) * 4 > (1 << 20):
        n *= 2
    return n


@functools.partial(jax.jit, static_argnames=("batch_block",))
def se_layer(x, w1, w2, batch_block=None):
    """x: (B, C, H, W); w1: (hidden, C); w2: (C, hidden) — PyTorch nn.Linear layout."""
    B, C, H, W = x.shape
    HW = H * W
    hidden = w1.shape[0]
    dtype = x.dtype
    itemsize = jnp.dtype(dtype).itemsize

    # Free row-major reshape (no transpose, no extra HBM pass). Spatial -> lane axis.
    # NOTE: HW is typically a multiple of 128 (lane-dense stores); small C only pads
    # sublanes. TODO(synk): for HW not a multiple of 128, stores fall back to masked
    # vst.msk — still correct, just slightly slower on the write path.
    x_flat = x.reshape(B, C, HW)
    w1t = jnp.asarray(w1, jnp.float32).T            # (C, hidden)
    w2t = jnp.asarray(w2, jnp.float32).T            # (hidden, C)

    tile_budget, vmem_cap = _vmem_budget()
    bb = _pick_batch_block(B, C, HW, itemsize, tile_budget) if batch_block is None \
        else int(batch_block)
    assert B % bb == 0, "batch_block must divide the batch size"
    num_blocks = B // bb
    n_pool_chunks = _pick_pool_chunks(HW, C, bb)
    # TODO(synk): if a single (1, C, HW) slab ever exceeds the VMEM budget (huge C*HW),
    # switch to a 2-phase HW-tiled grid (running-sum accumulator, gate finalized under
    # @pl.when on the last HW tile, then the rescale) at the cost of a second read of x.

    tile_bytes = bb * C * HW * itemsize
    w_bytes = 2 * 2 * C * hidden * 4                           # two f32 weights, double-buffered
    pool_tmp = bb * C * (HW // n_pool_chunks) * 4
    vmem_needed = 4 * tile_bytes + w_bytes + pool_tmp + (4 << 20)
    vmem_limit = int(min(max(vmem_needed, 32 << 20), vmem_cap))

    # Deepen input pipelining only when blocks are tiny and there are enough grid steps.
    x_extra = {}
    if num_blocks >= 4 and tile_bytes <= (2 << 20) and hasattr(pl, "Buffered"):
        x_extra["pipeline_mode"] = pl.Buffered(3)

    cost = pl.CostEstimate(
        flops=int(2 * B * C * HW + 4 * B * C * hidden),
        transcendentals=int(B * C),
        bytes_accessed=int(2 * B * C * HW * itemsize + 2 * 4 * C * hidden),
    )

    out = pl.pallas_call(
        functools.partial(_se_kernel, n_pool_chunks=n_pool_chunks),
        out_shape=jax.ShapeDtypeStruct((B, C, HW), dtype),
        grid_spec=pltpu.PrefetchScalarGridSpec(
            num_scalar_prefetch=0,
            grid=(num_blocks,),
            in_specs=[
                pl.BlockSpec((bb, C, HW), lambda b: (b, 0, 0), **x_extra),
                pl.BlockSpec((C, hidden), lambda b: (0, 0)),
                pl.BlockSpec((hidden, C), lambda b: (0, 0)),
            ],
            out_specs=pl.BlockSpec((bb, C, HW), lambda b: (b, 0, 0)),
        ),
        compiler_params=pltpu.CompilerParams(
            dimension_semantics=("parallel",),
            vmem_limit_bytes=vmem_limit,
        ),
        cost_estimate=cost,
    )(x_flat, w1t, w2t)

    return out.reshape(B, C, H, W)


def se_layer_ref(x, w1, w2):
    """Pure-JAX reference mirroring the PyTorch forward."""
    y = jnp.mean(x, axis=(2, 3))                    # (B, C)
    h = jnp.maximum(y @ w1.T, 0.0)                  # (B, hidden)
    s = jax.nn.sigmoid(h @ w2.T)                    # (B, C)
    return x * s[:, :, None, None]


if __name__ == "__main__":
    key = jax.random.PRNGKey(0)
    B, C, H, W = 2, 6, 16, 16          # channel=6, reduction=3 -> hidden=2
    reduction = 3
    hidden = C // reduction

    kx, k1, k2 = jax.random.split(key, 3)
    x = jax.random.normal(kx, (B, C, H, W), dtype=jnp.float32)
    # PyTorch nn.Linear weight layout: (out_features, in_features), no bias.
    w1 = jax.random.normal(k1, (hidden, C), dtype=jnp.float32) * 0.5
    w2 = jax.random.normal(k2, (C, hidden), dtype=jnp.float32) * 0.5

    ref = se_layer_ref(x, w1, w2)

    # f32, auto batch blocking (bb=1 here -> grid=(2,), pipelined multi-block path).
    out = jax.block_until_ready(se_layer(x, w1, w2))
    assert out.shape == (B, C, H, W)
    assert jnp.allclose(out, ref, atol=1e-5, rtol=1e-5), "f32 mismatch vs reference"

    # f32, whole batch in a single grid step.
    out_b2 = jax.block_until_ready(se_layer(x, w1, w2, batch_block=2))
    assert jnp.allclose(out_b2, ref, atol=1e-5, rtol=1e-5), "blocked mismatch vs reference"

    # bf16 end-to-end I/O (gate math stays in f32 inside the kernel).
    x_bf = x.astype(jnp.bfloat16)
    out_bf = jax.block_until_ready(se_layer(x_bf, w1, w2))
    ref_bf = se_layer_ref(x_bf.astype(jnp.float32), w1, w2)
    assert out_bf.dtype == jnp.bfloat16
    assert jnp.allclose(out_bf.astype(jnp.float32), ref_bf, atol=5e-2, rtol=5e-2), "bf16 mismatch"

    print("KERNEL_OK")
</pallas_src>

<mosaic_0001>
module attributes {stable_mosaic.version = 11 : i64} {
  func.func @_se_kernel(%arg0: i32, %arg1: memref<1x6x256xf32, #tpu.memory_space<vmem>>, %arg2: memref<6x2xf32, #tpu.memory_space<vmem>>, %arg3: memref<2x6xf32, #tpu.memory_space<vmem>>, %arg4: memref<1x6x256xf32, #tpu.memory_space<vmem>>) attributes {dimension_semantics = [#tpu.dimension_semantics<parallel>], iteration_bounds = array<i64: 2>, scalar_prefetch = 0 : i64, scratch_operands = 0 : i64, tpu.core_type = #tpu.core_type<tc>, window_params = [{transform_indices = @transform_0, window_bounds = array<i64: 1, 6, 256>}, {pipeline_mode = #tpu.pipeline_mode<synchronous>, transform_indices = @transform_1, window_bounds = array<i64: 6, 2>}, {pipeline_mode = #tpu.pipeline_mode<synchronous>, transform_indices = @transform_2, window_bounds = array<i64: 2, 6>}, {transform_indices = @transform_3, window_bounds = array<i64: 1, 6, 256>}]} {
    %cst = arith.constant 0.000000e+00 : f32
    %0 = vector.broadcast %cst : f32 to vector<1x6xf32>
    %c0 = arith.constant 0 : index
    %c0_0 = arith.constant 0 : index
    %c0_1 = arith.constant 0 : index
    %1 = vector.load %arg1[%c0, %c0_0, %c0_1] : memref<1x6x256xf32, #tpu.memory_space<vmem>>, vector<1x6x256xf32>
    %cst_2 = arith.constant dense<0.000000e+00> : vector<1x6xf32>
    %2 = vector.multi_reduction <add>, %1, %cst_2 [2] : vector<1x6x256xf32> to vector<1x6xf32>
    %3 = arith.addf %0, %2 : vector<1x6xf32>
    %cst_3 = arith.constant 3.906250e-03 : f32
    %4 = vector.broadcast %cst_3 : f32 to vector<1x6xf32>
    %5 = arith.mulf %3, %4 : vector<1x6xf32>
    %c0_4 = arith.constant 0 : index
    %c0_5 = arith.constant 0 : index
    %6 = vector.load %arg2[%c0_4, %c0_5] : memref<6x2xf32, #tpu.memory_space<vmem>>, vector<6x2xf32>
    %cst_6 = arith.constant dense<0.000000e+00> : vector<1x2xf32>
    %7 = tpu.matmul %5, %6, %cst_6 {dimension_numbers = #tpu.dot_dimension_numbers<[1], [0], [0], [1], [0, 0, 1, 1], [], []>} : vector<1x6xf32>, vector<6x2xf32>, vector<1x2xf32> -> vector<1x2xf32>
    %cst_7 = arith.constant 0.000000e+00 : f32
    %8 = vector.broadcast %cst_7 : f32 to vector<1x2xf32>
    %9 = arith.maximumf %7, %8 : vector<1x2xf32>
    %c0_8 = arith.constant 0 : index
    %c0_9 = arith.constant 0 : index
    %10 = vector.load %arg3[%c0_8, %c0_9] : memref<2x6xf32, #tpu.memory_space<vmem>>, vector<2x6xf32>
    %cst_10 = arith.constant dense<0.000000e+00> : vector<1x6xf32>
    %11 = tpu.matmul %9, %10, %cst_10 {dimension_numbers = #tpu.dot_dimension_numbers<[1], [0], [0], [1], [0, 0, 1, 1], [], []>} : vector<1x2xf32>, vector<2x6xf32>, vector<1x6xf32> -> vector<1x6xf32>
    %12 = arith.negf %11 : vector<1x6xf32>
    %13 = math.exp %12 : vector<1x6xf32>
    %cst_11 = arith.constant 1.000000e+00 : f32
    %14 = vector.broadcast %cst_11 : f32 to vector<1x6xf32>
    %15 = arith.addf %14, %13 : vector<1x6xf32>
    %16 = arith.divf %14, %15 : vector<1x6xf32>
    %17 = vector.shape_cast %16 : vector<1x6xf32> to vector<1x6x1xf32>
    %c0_12 = arith.constant 0 : index
    %c0_13 = arith.constant 0 : index
    %c0_14 = arith.constant 0 : index
    %18 = vector.load %arg1[%c0_12, %c0_13, %c0_14] : memref<1x6x256xf32, #tpu.memory_space<vmem>>, vector<1x6x256xf32>
    %19 = vector.broadcast %17 : vector<1x6x1xf32> to vector<1x6x256xf32>
    %20 = arith.mulf %18, %19 : vector<1x6x256xf32>
    %c0_15 = arith.constant 0 : index
    %c0_16 = arith.constant 0 : index
    %c0_17 = arith.constant 0 : index
    %21 = vector.load %arg4[%c0_15, %c0_16, %c0_17] : memref<1x6x256xf32, #tpu.memory_space<vmem>>, vector<1x6x256xf32>
    tpu.vector_store %arg4[%c0_15, %c0_16, %c0_17], %20 {strides = array<i32>} : memref<1x6x256xf32, #tpu.memory_space<vmem>>, vector<1x6x256xf32>,
    return
  }
  func.func @transform_0(%arg0: i32) -> (i32, i32, i32) {
    %c0_i32 = arith.constant 0 : i32
    %c0_i32_0 = arith.constant 0 : i32
    %c0_i32_1 = arith.constant 0 : i32
    return %arg0, %c0_i32, %c0_i32_0 : i32, i32, i32
  }
  func.func @transform_1(%arg0: i32) -> (i32, i32) {
    %c0_i32 = arith.constant 0 : i32
    %c0_i32_0 = arith.constant 0 : i32
    %c0_i32_1 = arith.constant 0 : i32
    return %c0_i32, %c0_i32_0 : i32, i32
  }
  func.func @transform_2(%arg0: i32) -> (i32, i32) {
    %c0_i32 = arith.constant 0 : i32
    %c0_i32_0 = arith.constant 0 : i32
    %c0_i32_1 = arith.constant 0 : i32
    return %c0_i32, %c0_i32_0 : i32, i32
  }
  func.func @transform_3(%arg0: i32) -> (i32, i32, i32) {
    %c0_i32 = arith.constant 0 : i32
    %c0_i32_0 = arith.constant 0 : i32
    %c0_i32_1 = arith.constant 0 : i32
    return %arg0, %c0_i32, %c0_i32_0 : i32, i32, i32
  }
}

</mosaic_0001>

<bundles_post_ra>
// kernel: se_layer.1
= control target key start
LH: loop header
LB: loop body
LE: loop exit
PB: predicated region body
PF: predicated region fallthrough
CT: control target
= control target key end

     0   :  { %s386_s12 = smov 0   ;;  %s416_s0 = inlined_call_operand.vmem [shape: f32[2,6,256], index: 0, kind: input, shape index: {}]   ;;  %s417_s1 = inlined_call_operand.vmem [shape: f32[6,2], index: 1, kind: input, shape index: {}]   ;;  %s418_s2 = inlined_call_operand.vmem [shape: f32[2,6], index: 2, kind: input, shape index: {}]   ;;  %s419_s3 = inlined_call_operand.vmem [shape: f32[2,6,256], index: 3, kind: output, shape index: {}]  }
   0x1 LB: > { %s327_s13 = sadd.s32 4294967295, %s364_s12   ;;  %p331_p0 = scmp.ge.s32.totalorder %s364_s12, 1  ;;  %s364_s12 = sphi %s386_s12, %s13_s12  }
   0x2   : > { %p137_p1 = scmp.lt.s32.totalorder %s364_s12, 3 }
   0x4   : > { %p138_p2 = pnand %p331_p0, %p137_p1 }
   0x5   : > { %p161_p3 = scmp.lt.s32.totalorder (!%p138_p2), %s327_s13, 1 }
   0x6   : > { %141 = sbr.rel (%p138_p2) target bundleno = 541 (0x21d), region = 32 }
   0xb   : > { %s421_s13 = smov (!%p161_p3, %s327_s13), 1  ;;  %vm173_vm0 = vcmask 1045504   ;;  %v181_v5 = vld [vmem:[%s417_s1] sm:$0x3f]  ;;  %v183_v6 = vlaneseq  ;;  %vm186_vm1 = vcmask 48128   ;;  %vm218_vm2 = vcmask 1041408  }
   0xc   : > { %s343_s14 = sshll.u32 %s421_s13, 4  ;;  %336 = vmatpush.msk.msra.mxu0 %vm173_vm0, %v181_v5  ;;  %v213_v11 = vld [vmem:[%s418_s2] sm:$0x3]  ;;  %vm214_vm3 = vcmask 15360  }
   0xd   : > { %s165_s17 = scalar_lea.vmem %s416_s0, %s343_s14  ;;  %v184_v7 = vand.u32 127, %v183_v6  ;;  %338 = vmatpush.msk.msra.mxu1 %vm218_vm2, %v213_v11  ;;  %v263_v14 = vshrl.u32 %v183_v6, 7  ;;  %s170_s24 = scalar_lea.vmem %s419_s3, %s343_s14 }
   0xe   : > { %v171_v0 = vld [vmem:[%s165_s17] sm:$0x3f]  ;;  %v172_v1 = vld [vmem:[%s165_s17 + $0x8] sm:$0x3f] }
   0xf   : > { %v174_v2 = vsel %vm173_vm0, %v171_v0, 0.0  ;;  %v175_v3 = vsel %vm173_vm0, %v172_v1, 0.0  ;;  %353 = vset.pattern.permute.xlu0 %v263_v14 }
  0x10   : > { %v176_v4 = vadd.f32 %v175_v3, %v174_v2 }
  0x12   : > { %177 = vadd.xlane.f32.xlu0 %v176_v4 }
  0x85   : > { %v178_v8 = vpop.xlane.xlu0 %177 }
  0x86   : > { %v180_v9 = vmul.f32 0.00390625, %v178_v8 }
  0x88   : > { %v185_v10 = vperm.slane %v180_v9, %v184_v7 }
  0x8a   : > { %337 = vmatmul.msk.f32.vlgmr.msra.gmra.mxu0 %vm186_vm1, %v185_v10 }
 0x107   : > { %v209_v12 = vpop.f32.mrf.mxu0 }
 0x108   : > { %v212_v13 = vmax.f32 %v209_v12, 0.0 }
 0x10a   : > { %339 = vmatmul.msk.f32.vlgmr.msra.gmra.mxu1 %vm214_vm3, %v212_v13 }
 0x187   : > { %v239_v15 = vpop.f32.mrf.mxu1 }
 0x188   : > { %v340_v16 = vmul.f32 -1.442695, %v239_v15 }
 0x18a   : > { %354 = vpow2.f32 %v340_v16 }
 0x190   : > { %v355_v17 = vpop.eup %354 }
 0x191   : > { %v245_v18 = vadd.f32 1.0, %v355_v17 }
 0x193   : > { %356 = vrcp.f32 %v245_v18  ;;  %v257_v22 = vand.u32 2147483648, %v245_v18  ;;  %v255_v24 = vand.u32 2147483647, %v245_v18  ;;  %vm251_vm5 = vweird.f32 %v245_v18 }
 0x195   : > { %v258_v26 = vor.u32 1.1754944e-38, %v257_v22  ;;  %vm256_vm7 = vcmp.eq.f32.partialorder %v255_v24, 8.507059e+37 }
 0x199   : > { %v357_v19 = vpop.eup %356 }
 0x19a   : > { %v247_v20 = vmul.f32 %v357_v19, %v245_v18  ;;  %vm252_vm4 = vweird.f32 %v357_v19 }
 0x19b   : > { %vm253_vm6 = vmor %vm251_vm5, %vm252_vm4 }
 0x19c   : > { %v248_v21 = vsub.f32 1.0, %v247_v20 }
 0x19e   : > { %v249_v23 = vmul.f32 %v357_v19, %v248_v21 }
 0x1a0   : > { %v250_v25 = vadd.f32 %v357_v19, %v249_v23 }
 0x1a2   : > { %v254_v27 = vsel %vm253_vm6, %v357_v19, %v250_v25 }
 0x1a3   : > { %v259_v28 = vsel %vm256_vm7, %v258_v26, %v254_v27 }
 0x1a4   : > { %v261_v29 = vperm.slane %v259_v28, 0 }
 0x1a6   : > { %266 = vperm.xlu0 %353, %v261_v29  }
 0x218   : > { %v267_v30 = vpop.permute.xlu0 %266 }
 0x219   : > { %v268_v31 = vmul.f32 %v267_v30, %v171_v0  ;;  %v269_v32 = vmul.f32 %v267_v30, %v172_v1 }
 0x21b   : > { %270 = vst [vmem:[%s170_s24] sm:$0x3f] %v268_v31 }
 0x21c   : > { %271 = vst [vmem:[%s170_s24 + $0x8] sm:$0x3f] %v269_v32 }
 0x21d PF: > { %s13_s12 = sadd.s32 1, %s364_s12  }
 0x21e   : > { %p10_p4 = scmp.ge.s32.totalorder %s13_s12, 4  }
 0x220   :  { %12 = sbr.rel (!%p10_p4) target bundleno = 1 (0x1), region = 62 }

</bundles_post_ra>
